<compile_context>
chip_gen: v5e
topology: v5e:2x2
jax: 0.10.0
libtpu: 0.0.40
codegen_flags: <defaults>
</compile_context>

<pallas_src>
import jax
import jax.numpy as jnp
from jax.experimental import pallas as pl
from jax.experimental.pallas import tpu as pltpu

INPUT_SIZE = 80
MID_SIZE = 60
HIDDEN_SIZE = 40
PAD = 128           # lane-dense width for every layer
NUM_LAYERS = 4

LAYER_DIMS = [
    (INPUT_SIZE, MID_SIZE),    # encoder Linear(80, 60)
    (MID_SIZE, HIDDEN_SIZE),   # encoder Linear(60, 40)
    (HIDDEN_SIZE, MID_SIZE),   # decoder Linear(40, 60)
    (MID_SIZE, INPUT_SIZE),    # decoder Linear(60, 80)
]


# ----------------------------------------------------------------------------- kernel
def autoencoder_kernel(x_ref, w_ref, b_ref, out_ref):
    """Fused 4-layer MLP on one (TILE_B, 128) batch tile.

    x_ref  : (TILE_B, 128) bf16   -- pipelined per grid step
    w_ref  : (4, 128, 128) bf16   -- packed weight slab, resident in VMEM
    b_ref  : (4, 128)      f32    -- packed bias slab, resident in VMEM
    out_ref: (TILE_B, 128) f32
    """
    h = x_ref[...]  # bf16 MXU operand

    def layer(h_bf16, idx, relu):
        w = w_ref[idx]                 # static slice -> free, (128,128) bf16
        b = b_ref[idx]                 # static slice -> free, (128,)   f32
        y = jnp.dot(h_bf16, w, preferred_element_type=jnp.float32) + b   # f32 VPU add
        if relu:
            y = jnp.maximum(y, 0.0)    # f32 VPU
        return y

    h = layer(h, 0, True).astype(jnp.bfloat16)   # Linear(80->60) + ReLU
    h = layer(h, 1, True).astype(jnp.bfloat16)   # Linear(60->40) + ReLU
    h = layer(h, 2, True).astype(jnp.bfloat16)   # Linear(40->60) + ReLU
    y = layer(h, 3, False)                       # Linear(60->80), no activation

    out_ref[...] = y


# ----------------------------------------------------------------------------- params
def init_linear_params(key, fan_in, fan_out):
    """PyTorch-style init U(-1/sqrt(fan_in), +1/sqrt(fan_in)); weight stored (in, out)."""
    kw, kb = jax.random.split(key)
    bound = 1.0 / jnp.sqrt(jnp.float32(fan_in))
    w = jax.random.uniform(kw, (fan_in, fan_out), jnp.float32, -bound, bound)
    b = jax.random.uniform(kb, (fan_out,), jnp.float32, -bound, bound)
    return w, b


def pack_params(params):
    """Zero-pad every layer to (128,128)/(128,) and stack into two slabs.

    Zero padding keeps the math exact: padded input lanes are zero and padded
    weight rows/cols are zero, so padded output lanes stay exactly zero."""
    w_slab = jnp.zeros((NUM_LAYERS, PAD, PAD), jnp.float32)
    b_slab = jnp.zeros((NUM_LAYERS, PAD), jnp.float32)
    for i, (w, b) in enumerate(params):
        fi, fo = w.shape
        w_slab = w_slab.at[i, :fi, :fo].set(w)
        b_slab = b_slab.at[i, :fo].set(b)
    return w_slab.astype(jnp.bfloat16), b_slab


# ----------------------------------------------------------------------------- wrapper
def autoencoder_forward(x, w_slab, b_slab, *, tile_b=256):
    """x: (B, 80) f32 -> (B, 80) f32."""
    B, F = x.shape
    assert F == INPUT_SIZE

    # Pad batch to a multiple-of-8 tile, features to lane-dense 128; x goes bf16
    # (halves DMA bytes for the only operand that scales with B).
    b8 = ((B + 7) // 8) * 8
    tb = min(tile_b, b8)
    b_pad = ((b8 + tb - 1) // tb) * tb
    x_p = jnp.zeros((b_pad, PAD), jnp.bfloat16).at[:B, :F].set(x.astype(jnp.bfloat16))

    grid = (b_pad // tb,)
    flops = 2 * b_pad * NUM_LAYERS * PAD * PAD
    bytes_accessed = b_pad * PAD * (2 + 4) + w_slab.size * 2 + b_slab.size * 4

    out_p = pl.pallas_call(
        autoencoder_kernel,
        out_shape=jax.ShapeDtypeStruct((b_pad, PAD), jnp.float32),
        grid_spec=pltpu.PrefetchScalarGridSpec(
            num_scalar_prefetch=0,
            grid=grid,
            in_specs=[
                # batch tile of x: pipelined / double-buffered across grid steps
                pl.BlockSpec((tb, PAD), lambda i: (i, 0)),
                # packed weight slab: constant index_map -> stays resident in VMEM
                pl.BlockSpec((NUM_LAYERS, PAD, PAD), lambda i: (0, 0, 0)),
                # packed bias slab: constant index_map -> stays resident in VMEM
                pl.BlockSpec((NUM_LAYERS, PAD), lambda i: (0, 0)),
            ],
            out_specs=pl.BlockSpec((tb, PAD), lambda i: (i, 0)),
        ),
        compiler_params=pltpu.CompilerParams(
            dimension_semantics=("parallel",),   # shards batch tiles across v7x's 2 TCs
        ),
        cost_estimate=pl.CostEstimate(
            flops=flops, transcendentals=0, bytes_accessed=bytes_accessed),
    )(x_p, w_slab, b_slab)

    return out_p[:B, :INPUT_SIZE]


# ----------------------------------------------------------------------------- references
def reference_forward_f32(x, params):
    """Plain f32 reference matching the original PyTorch module's math."""
    h = x
    for i, (w, b) in enumerate(params):
        h = jnp.dot(h, w, preferred_element_type=jnp.float32) + b
        if i < NUM_LAYERS - 1:
            h = jnp.maximum(h, 0.0)
    return h


def reference_forward_bf16(x, w_slab, b_slab):
    """Mirrors the kernel's math exactly: bf16 MXU operands, f32 accumulation."""
    h = jnp.zeros((x.shape[0], PAD), jnp.bfloat16).at[:, :INPUT_SIZE].set(
        x.astype(jnp.bfloat16))
    y = None
    for i in range(NUM_LAYERS):
        y = jnp.dot(h, w_slab[i], preferred_element_type=jnp.float32) + b_slab[i]
        if i < NUM_LAYERS - 1:
            h = jnp.maximum(y, 0.0).astype(jnp.bfloat16)
    return y[:, :INPUT_SIZE]


# ----------------------------------------------------------------------------- demo
if __name__ == "__main__":
    key = jax.random.PRNGKey(0)
    kx, k1, k2, k3, k4 = jax.random.split(key, 5)

    batch = 32
    x = jax.random.normal(kx, (batch, INPUT_SIZE), jnp.float32)

    params = tuple(init_linear_params(k, fi, fo)
                   for k, (fi, fo) in zip((k1, k2, k3, k4), LAYER_DIMS))
    w_slab, b_slab = pack_params(params)

    # small tile_b so the demo exercises a multi-step grid (32 rows -> 4 steps)
    out = autoencoder_forward(x, w_slab, b_slab, tile_b=8)
    out = jax.block_until_ready(out)
    assert out.shape == (batch, INPUT_SIZE)

    # Exact-math check (same bf16-operand / f32-accumulate recipe as the kernel).
    ref_bf16 = reference_forward_bf16(x, w_slab, b_slab)
    assert jnp.allclose(out, ref_bf16, atol=1e-3, rtol=1e-3), \
        "mismatch vs bf16-matched JAX reference"

    # Semantics check vs the original full-f32 module math (bf16 rounding tolerance).
    ref_f32 = reference_forward_f32(x, params)
    assert jnp.allclose(out, ref_f32, atol=5e-2, rtol=5e-2), \
        "mismatch vs f32 JAX reference"

    # TODO(synk): training utilities (fit/_evaluate_dl, MSELoss, Adam) are host-side
    # PyTorch training loops, not part of the forward pass; not translated.
    print("KERNEL_OK")
</pallas_src>

<mosaic_0001>
module attributes {stable_mosaic.version = 11 : i64} {
  func.func @autoencoder_kernel(%arg0: i32, %arg1: memref<8x128xbf16, #tpu.memory_space<vmem>>, %arg2: memref<4x128x128xbf16, #tpu.memory_space<vmem>>, %arg3: memref<4x128xf32, #tpu.memory_space<vmem>>, %arg4: memref<8x128xf32, #tpu.memory_space<vmem>>) attributes {dimension_semantics = [#tpu.dimension_semantics<parallel>], iteration_bounds = array<i64: 4>, scalar_prefetch = 0 : i64, scratch_operands = 0 : i64, tpu.core_type = #tpu.core_type<tc>, window_params = [{transform_indices = @transform_0, window_bounds = array<i64: 8, 128>}, {pipeline_mode = #tpu.pipeline_mode<synchronous>, transform_indices = @transform_1, window_bounds = array<i64: 4, 128, 128>}, {pipeline_mode = #tpu.pipeline_mode<synchronous>, transform_indices = @transform_2, window_bounds = array<i64: 4, 128>}, {transform_indices = @transform_3, window_bounds = array<i64: 8, 128>}]} {
    %c0 = arith.constant 0 : index
    %c0_0 = arith.constant 0 : index
    %0 = vector.load %arg1[%c0, %c0_0] : memref<8x128xbf16, #tpu.memory_space<vmem>>, vector<8x128xbf16>
    %c0_1 = arith.constant 0 : index
    %c0_2 = arith.constant 0 : index
    %c0_3 = arith.constant 0 : index
    %1 = vector.load %arg2[%c0_1, %c0_2, %c0_3] : memref<4x128x128xbf16, #tpu.memory_space<vmem>>, vector<1x128x128xbf16>
    %2 = vector.shape_cast %1 : vector<1x128x128xbf16> to vector<128x128xbf16>
    %c0_4 = arith.constant 0 : index
    %c0_5 = arith.constant 0 : index
    %3 = vector.load %arg3[%c0_4, %c0_5] : memref<4x128xf32, #tpu.memory_space<vmem>>, vector<1x128xf32>
    %4 = vector.shape_cast %3 : vector<1x128xf32> to vector<128xf32>
    %cst = arith.constant dense<0.000000e+00> : vector<8x128xf32>
    %5 = tpu.matmul %0, %2, %cst {dimension_numbers = #tpu.dot_dimension_numbers<[1], [0], [0], [1], [0, 0, 1, 1], [], []>} : vector<8x128xbf16>, vector<128x128xbf16>, vector<8x128xf32> -> vector<8x128xf32>
    %6 = vector.shape_cast %4 : vector<128xf32> to vector<1x128xf32>
    %7 = vector.broadcast %6 : vector<1x128xf32> to vector<8x128xf32>
    %8 = arith.addf %5, %7 : vector<8x128xf32>
    %cst_6 = arith.constant 0.000000e+00 : f32
    %9 = vector.broadcast %cst_6 : f32 to vector<8x128xf32>
    %10 = arith.maximumf %8, %9 : vector<8x128xf32>
    %11 = arith.truncf %10 : vector<8x128xf32> to vector<8x128xbf16>
    %c1 = arith.constant 1 : index
    %c0_7 = arith.constant 0 : index
    %c0_8 = arith.constant 0 : index
    %12 = vector.load %arg2[%c1, %c0_7, %c0_8] : memref<4x128x128xbf16, #tpu.memory_space<vmem>>, vector<1x128x128xbf16>
    %13 = vector.shape_cast %12 : vector<1x128x128xbf16> to vector<128x128xbf16>
    %c1_9 = arith.constant 1 : index
    %c0_10 = arith.constant 0 : index
    %14 = vector.load %arg3[%c1_9, %c0_10] : memref<4x128xf32, #tpu.memory_space<vmem>>, vector<1x128xf32>
    %15 = vector.shape_cast %14 : vector<1x128xf32> to vector<128xf32>
    %cst_11 = arith.constant dense<0.000000e+00> : vector<8x128xf32>
    %16 = tpu.matmul %11, %13, %cst_11 {dimension_numbers = #tpu.dot_dimension_numbers<[1], [0], [0], [1], [0, 0, 1, 1], [], []>} : vector<8x128xbf16>, vector<128x128xbf16>, vector<8x128xf32> -> vector<8x128xf32>
    %17 = vector.shape_cast %15 : vector<128xf32> to vector<1x128xf32>
    %18 = vector.broadcast %17 : vector<1x128xf32> to vector<8x128xf32>
    %19 = arith.addf %16, %18 : vector<8x128xf32>
    %cst_12 = arith.constant 0.000000e+00 : f32
    %20 = vector.broadcast %cst_12 : f32 to vector<8x128xf32>
    %21 = arith.maximumf %19, %20 : vector<8x128xf32>
    %22 = arith.truncf %21 : vector<8x128xf32> to vector<8x128xbf16>
    %c2 = arith.constant 2 : index
    %c0_13 = arith.constant 0 : index
    %c0_14 = arith.constant 0 : index
    %23 = vector.load %arg2[%c2, %c0_13, %c0_14] : memref<4x128x128xbf16, #tpu.memory_space<vmem>>, vector<1x128x128xbf16>
    %24 = vector.shape_cast %23 : vector<1x128x128xbf16> to vector<128x128xbf16>
    %c2_15 = arith.constant 2 : index
    %c0_16 = arith.constant 0 : index
    %25 = vector.load %arg3[%c2_15, %c0_16] : memref<4x128xf32, #tpu.memory_space<vmem>>, vector<1x128xf32>
    %26 = vector.shape_cast %25 : vector<1x128xf32> to vector<128xf32>
    %cst_17 = arith.constant dense<0.000000e+00> : vector<8x128xf32>
    %27 = tpu.matmul %22, %24, %cst_17 {dimension_numbers = #tpu.dot_dimension_numbers<[1], [0], [0], [1], [0, 0, 1, 1], [], []>} : vector<8x128xbf16>, vector<128x128xbf16>, vector<8x128xf32> -> vector<8x128xf32>
    %28 = vector.shape_cast %26 : vector<128xf32> to vector<1x128xf32>
    %29 = vector.broadcast %28 : vector<1x128xf32> to vector<8x128xf32>
    %30 = arith.addf %27, %29 : vector<8x128xf32>
    %cst_18 = arith.constant 0.000000e+00 : f32
    %31 = vector.broadcast %cst_18 : f32 to vector<8x128xf32>
    %32 = arith.maximumf %30, %31 : vector<8x128xf32>
    %33 = arith.truncf %32 : vector<8x128xf32> to vector<8x128xbf16>
    %c3 = arith.constant 3 : index
    %c0_19 = arith.constant 0 : index
    %c0_20 = arith.constant 0 : index
    %34 = vector.load %arg2[%c3, %c0_19, %c0_20] : memref<4x128x128xbf16, #tpu.memory_space<vmem>>, vector<1x128x128xbf16>
    %35 = vector.shape_cast %34 : vector<1x128x128xbf16> to vector<128x128xbf16>
    %c3_21 = arith.constant 3 : index
    %c0_22 = arith.constant 0 : index
    %36 = vector.load %arg3[%c3_21, %c0_22] : memref<4x128xf32, #tpu.memory_space<vmem>>, vector<1x128xf32>
    %37 = vector.shape_cast %36 : vector<1x128xf32> to vector<128xf32>
    %cst_23 = arith.constant dense<0.000000e+00> : vector<8x128xf32>
    %38 = tpu.matmul %33, %35, %cst_23 {dimension_numbers = #tpu.dot_dimension_numbers<[1], [0], [0], [1], [0, 0, 1, 1], [], []>} : vector<8x128xbf16>, vector<128x128xbf16>, vector<8x128xf32> -> vector<8x128xf32>
    %39 = vector.shape_cast %37 : vector<128xf32> to vector<1x128xf32>
    %40 = vector.broadcast %39 : vector<1x128xf32> to vector<8x128xf32>
    %41 = arith.addf %38, %40 : vector<8x128xf32>
    %c0_24 = arith.constant 0 : index
    %c0_25 = arith.constant 0 : index
    %42 = vector.load %arg4[%c0_24, %c0_25] : memref<8x128xf32, #tpu.memory_space<vmem>>, vector<8x128xf32>
    tpu.vector_store %arg4[%c0_24, %c0_25], %41 {strides = array<i32>} : memref<8x128xf32, #tpu.memory_space<vmem>>, vector<8x128xf32>,
    return
  }
  func.func @transform_0(%arg0: i32) -> (i32, i32) {
    %c0_i32 = arith.constant 0 : i32
    %c0_i32_0 = arith.constant 0 : i32
    return %arg0, %c0_i32 : i32, i32
  }
  func.func @transform_1(%arg0: i32) -> (i32, i32, i32) {
    %c0_i32 = arith.constant 0 : i32
    %c0_i32_0 = arith.constant 0 : i32
    %c0_i32_1 = arith.constant 0 : i32
    %c0_i32_2 = arith.constant 0 : i32
    return %c0_i32, %c0_i32_0, %c0_i32_1 : i32, i32, i32
  }
  func.func @transform_2(%arg0: i32) -> (i32, i32) {
    %c0_i32 = arith.constant 0 : i32
    %c0_i32_0 = arith.constant 0 : i32
    %c0_i32_1 = arith.constant 0 : i32
    return %c0_i32, %c0_i32_0 : i32, i32
  }
  func.func @transform_3(%arg0: i32) -> (i32, i32) {
    %c0_i32 = arith.constant 0 : i32
    %c0_i32_0 = arith.constant 0 : i32
    return %arg0, %c0_i32 : i32, i32
  }
}

</mosaic_0001>

<bundles_post_ra>
// kernel: tpu_custom_call.1
= control target key start
LH: loop header
LB: loop body
LE: loop exit
PB: predicated region body
PF: predicated region fallthrough
CT: control target
= control target key end

     0   :  { %8 = vsyncpa [#allocation3], 0  ;;  %s1233_s0 = inlined_call_operand.hbm [shape: bf16[32,128], index: 0, kind: input, shape index: {}]   ;;  %s1234_s1 = inlined_call_operand.hbm [shape: bf16[4,128,128], index: 1, kind: input, shape index: {}]   ;;  %s1235_s2 = inlined_call_operand.hbm [shape: f32[4,128], index: 2, kind: input, shape index: {}]   ;;  %s1236_s3 = inlined_call_operand.hbm [shape: f32[32,128], index: 3, kind: output, shape index: {}]  }
   0x1   :  { %10 = vsyncpa [#allocation3 + $0x1], 0 }
   0x2   :  { %11 = vsyncpa [#allocation6], 0 }
   0x3   :  { %12 = vsyncpa [#allocation4], 0 }
   0x4   :  { %14 = vsyncpa [#allocation4 + $0x1], 0  ;;  %s1086_s12 = smov 0   ;;  %s1088_s13 = smov 0  }
   0x5   :  { %s1090_s14 = smov 0   ;;  %s1092_s15 = smov 0  }
   0x6 LB: > { %s130_s18 = sshll.u32 %s1234_s1, 4  ;;  %s1110_s19 = sadd.s32 4294967295, %s1060_s15   ;;  %s1060_s15 = sphi %s1092_s15, %s1246_s15   ;;  %s1056_s14 = sphi %s1090_s14, %s1245_s14   ;;  %s1052_s13 = sphi %s1088_s13, %s1244_s13   ;;  %s1048_s12 = sphi %s1086_s12, %s1243_s12   ;;  %s131_s18 = int_to_ptr.hbm [resolvable:$true] %s130_s18 }
   0x7   : > { %p652_p0 = scmp.ge.s32.totalorder %s1060_s15, 1  ;;  %p41_p1 = scmp.eq.s32.totalorder %s1110_s19, 0 }
   0x8   : > { %p119_p2 = scmp.lt.s32.totalorder %s1060_s15, 5  ;;  %s1062_s21 = smov [#allocation5]  }
   0x9   : > { %s132_s22 = sshll.u32 %s1062_s21, 4  ;;  %s145_s25 = sshll.u32 %s1235_s2, 4  ;;  %s133_s22 = int_to_ptr.vmem [resolvable:$true] %s132_s22  ;;  %s146_s25 = int_to_ptr.hbm [resolvable:$true] %s145_s25 }
   0xa   : > { %p1115_p3 = pnand %p652_p0, %p119_p2  ;;  %s1063_s26 = smov [#allocation7]  }
   0xb   : > { %s147_s27 = sshll.u32 %s1063_s26, 4  ;;  %s1064_s28 = smov 64   ;;  %s148_s27 = int_to_ptr.vmem [resolvable:$true] %s147_s27 }
   0xc   : > { %p839_p4 = pneg %p1115_p3  ;;  %s1065_s29 = smov 4  }
   0xd   : > { %s651_s30 = sadd.s32 4294967294, %s1060_s15   ;;  %s1128_s4 = sadd.s32 1, %s1060_s15  }
   0xe   : > { %p840_p5 = pnand %p839_p4, %p41_p1  ;;  %s24_s5 = ssub.s32 %s1060_s15, %s1128_s4 }
   0xf   : > { %s27_s6 = sadd.s32 1, %s1056_s14  ;;  %p25_p6 = scmp.eq.s32.totalorder %s24_s5, 0 }
  0x10   : > { %842 = dma.hbm_to_vmem [thread:$0]  (!%p840_p5), %s131_s18, 4096, %s133_s22, [#allocation6], %s1064_s28, %s1064_s28, %s1065_s29  }
  0x11   : > { %845 = dma.hbm_to_vmem [thread:$0]  (!%p840_p5), %s146_s25, 64, %s148_s27, [#allocation6]  }
  0x12   : > { %p34_p7 = scmp.ne.s32.totalorder %s1056_s14, %s1052_s13  ;;  %p35_p8 = scmp.eq.s32.totalorder %s1060_s15, 0 }
  0x13   : > { %p40_p9 = scmp.ne.s32.totalorder %s1052_s13, %s1048_s12  ;;  %p106_p12 = scmp.eq.s32.totalorder %s1110_s19, 3 }
  0x14   : > { %s1139_s7 = scalar_select %p25_p6, %s1056_s14, %s27_s6  }
  0x15   : > { %p1141_p10 = por %p35_p8, %p34_p7  ;;  %p1147_p11 = por %p41_p1, %p40_p9 }
  0x16   : > { %p112_p13 = scmp.eq.s32.totalorder %s651_s30, 3  ;;  %p856_p0 = scmp.lt.s32.totalorder %s1060_s15, 4 }
  0x17   : > { %s158_s10 = sand.u32 1, %s1056_s14   ;;  %p1154_p2 = por %p106_p12, %p34_p7 }
  0x18   : > { %p1158_p4 = por %p112_p13, %p40_p9  ;;  %s656_s17 = sshll.u32 %s158_s10, 2 }
  0x19   : > { %s657_s18 = sshll.u32 %s1060_s15, 2  ;;  %s162_s24 = scalar_lea.vmem [#allocation2], %s656_s17 }
  0x1a   : > { %s166_s23 = scalar_lea.hbm %s1233_s0, %s657_s18  ;;  %s170_s25 = sshll.u32 %s162_s24, 4  ;;  %s171_s25 = int_to_ptr.vmem [resolvable:$true] %s170_s25 }
  0x1b   : > { %s168_s26 = sshll.u32 %s166_s23, 4  ;;  %p1168_p5 = pnand %p856_p0, %p1141_p10  ;;  %s169_s26 = int_to_ptr.hbm [resolvable:$true] %s168_s26 }
  0x1c   : > { %s159_s28 = scalar_lea.sflag [#allocation3], %s158_s10  ;;  %s960_s29 = sshra.s32 %s169_s26, 4  ;;  %s961_s29 = int_to_ptr.hbm [resolvable:$true] %s960_s29 }
  0x1d   : > { %s962_s30 = scalar_lea.hbm %s961_s29, 4  ;;  %p964_p7 = pneg %p1168_p5 }
  0x1e   : > { %p963_p6 = scmp.ne.s32.totalorder %s961_s29, %s962_s30  ;;  %s967_s17 = scalar_lea.hbm %s1233_s0, 16 }
  0x1f   : > { %p968_p10 = scmp.lt.s32.totalorder %s961_s29, %s1233_s0  ;;  %p969_p12 = scmp.lt.s32.totalorder %s967_s17, %s962_s30 }
  0x20   : > { %p965_p8 = pnand %p964_p7, %p963_p6 }
  0x21   : > { %p970_p13 = por %p969_p12, %p968_p10 }
  0x22   : > { %p966_p9 = pneg %p965_p8 }
  0x24   : > { %p971_p0 = pnand %p970_p13, %p966_p9 }
  0x26   : > { %974 = shalt.err (!%p971_p0)
}
  0x27   : > { %849 = dma.hbm_to_vmem [thread:$0]  (!%p1168_p5), %s169_s26, 64, %s171_s25, %s159_s28  }
  0x28   : > { %179 = sbr.rel (%p1115_p3) target bundleno = 622 (0x26e), region = 32  ;;  %s1185_s10 = sand.u32 (!%p1115_p3), 1, %s1052_s13  }
  0x29   : > { %s659_s21 = sshll.u32 (!%p1115_p3), %s1185_s10, 2  ;;  %s182_s22 = scalar_lea.sflag (!%p1115_p3), [#allocation3], %s1185_s10 }
  0x2a   : > { %s1189_s23 = scalar_lea.vmem (!%p1115_p3), [#allocation2], %s659_s21 }
  0x2d   : > { %1035 = dma.done.wait (%p1147_p11), %s182_s22, 64  }
  0x2e   : > { %1037 = vsyncadd (%p1147_p11), %s182_s22, 4294967232 }
  0x2f   : > { %1039 = dma.done.wait (%p41_p1), [#allocation6], 4160  }
  0x30   : > { %1041 = vsyncadd (%p41_p1), [#allocation6], 4294963136  ;;  %v802_v0 = vld [vmem:[#allocation5 + $0x38] sm:$0xff]  ;;  %v801_v1 = vld [vmem:[#allocation5 + $0x30] sm:$0xff]  ;;  %s792_s20 = sshll.u32 %s1110_s19, 3  ;;  %s662_s9 = sshll.u32 %s1185_s10, 3 }
  0x31   : > { %286 = vmatpush.bf16.msra.mxu0 %v802_v0  ;;  %v810_v2 = vld [vmem:[#allocation5 + $0x78] sm:$0xff]  ;;  %v809_v3 = vld [vmem:[#allocation5 + $0x70] sm:$0xff]  ;;  %v800_v4 = vld [vmem:[#allocation5 + $0x28] sm:$0xff]  ;;  %s557_s26 = scalar_lea.hbm %s1236_s3, %s792_s20  ;;  %s218_s27 = scalar_lea.vmem [#allocation8], %s662_s9 }
  0x32   : > { %368 = vmatpush.bf16.msra.mxu1 %v810_v2  ;;  %v808_v5 = vld [vmem:[#allocation5 + $0x68] sm:$0xff]  ;;  %v799_v6 = vld [vmem:[#allocation5 + $0x20] sm:$0xff]  ;;  %v798_v8 = vld [vmem:[#allocation5 + $0x18] sm:$0xff]  ;;  %s559_s28 = sshll.u32 %s218_s27, 4  ;;  %s561_s29 = sshll.u32 %s557_s26, 4  ;;  %s560_s28 = int_to_ptr.vmem [resolvable:$true] %s559_s28  ;;  %s562_s29 = int_to_ptr.hbm [resolvable:$true] %s561_s29 }
  0x33   : > { %v807_v7 = vld [vmem:[#allocation5 + $0x60] sm:$0xff]  ;;  %v806_v9 = vld [vmem:[#allocation5 + $0x58] sm:$0xff]  ;;  %v797_v10 = vld [vmem:[#allocation5 + $0x10] sm:$0xff]  ;;  %s547_s30 = scalar_lea.sflag [#allocation4], %s1185_s10  ;;  %s1004_s5 = sshra.s32 %s562_s29, 4  ;;  %s1005_s5 = int_to_ptr.hbm [resolvable:$true] %s1004_s5 }
  0x34   : > { %v805_v11 = vld [vmem:[#allocation5 + $0x50] sm:$0xff]  ;;  %v796_v12 = vld [vmem:[#allocation5 + $0x8] sm:$0xff]  ;;  %v795_v13 = vld [vmem:[#allocation5] sm:$0xff]  ;;  %s1006_s6 = scalar_lea.hbm %s1005_s5, 8  ;;  %s1010_s18 = scalar_lea.hbm %s1236_s3, 32 }
  0x35   : > { %287 = vmatpush.bf16.msra.mxu0 %v801_v1  ;;  %v219_v14 = vld [vmem:[%s1189_s23] sm:$0xf]  ;;  %v804_v15 = vld [vmem:[#allocation5 + $0x48] sm:$0xff]  ;;  %v803_v16 = vld [vmem:[#allocation5 + $0x40] sm:$0xff]  ;;  %p1007_p1 = scmp.ne.s32.totalorder %s1005_s5, %s1006_s6  ;;  %p1011_p5 = scmp.lt.s32.totalorder %s1005_s5, %s1236_s3 }
  0x36   : > { %369 = vmatpush.bf16.msra.mxu1 %v809_v3  ;;  %v818_v17 = vld [vmem:[#allocation5 + $0xb8] sm:$0xff]  ;;  %v817_v18 = vld [vmem:[#allocation5 + $0xb0] sm:$0xff]  ;;  %v816_v19 = vld [vmem:[#allocation5 + $0xa8] sm:$0xff]  ;;  %p1012_p6 = scmp.lt.s32.totalorder %s1010_s18, %s1006_s6 }
  0x37   : > { %450 = vmatpush.bf16.msra.mxu2 %v818_v17  ;;  %v815_v20 = vld [vmem:[#allocation5 + $0xa0] sm:$0xff]  ;;  %v814_v21 = vld [vmem:[#allocation5 + $0x98] sm:$0xff]  ;;  %v813_v22 = vld [vmem:[#allocation5 + $0x90] sm:$0xff]  ;;  %p1008_p3 = pnand %p1007_p1, %p1154_p2 }
  0x38   : > { %v896_v23 = vld [vmem:[#allocation7] ss:$0 sm:$0xff]  ;;  %v812_v29 = vld [vmem:[#allocation5 + $0x88] sm:$0xff]  ;;  %v826_v31 = vld [vmem:[#allocation5 + $0xf8] sm:$0xff]  ;;  %p1013_p7 = por %p1012_p6, %p1011_p5 }
  0x39   : > { %288 = vmatpush.bf16.msra.mxu0 %v800_v4  ;;  %v811_v30 = vld [vmem:[#allocation5 + $0x80] sm:$0xff]  ;;  %532 = vmatpush.bf16.msra.mxu3 %v826_v31  ;;  %v825_v32 = vld [vmem:[#allocation5 + $0xf0] sm:$0xff]  ;;  %v824_v33 = vld [vmem:[#allocation5 + $0xe8] sm:$0xff]  ;;  %p1009_p11 = pneg %p1008_p3 }
  0x3a   : > { %370 = vmatpush.bf16.msra.mxu1 %v808_v5  ;;  %v823_v34 = vld [vmem:[#allocation5 + $0xe0] sm:$0xff]  ;;  %v822_v35 = vld [vmem:[#allocation5 + $0xd8] sm:$0xff]  ;;  %v821_v36 = vld [vmem:[#allocation5 + $0xd0] sm:$0xff] }
  0x3b   : > { %451 = vmatpush.bf16.msra.mxu2 %v817_v18  ;;  %v897_v37 = vld [vmem:[#allocation7 + $0x1] ss:$0 sm:$0xff]  ;;  %v820_v43 = vld [vmem:[#allocation5 + $0xc8] sm:$0xff]  ;;  %v898_v45 = vld [vmem:[#allocation7 + $0x2] ss:$0 sm:$0xff]  ;;  %p1014_p8 = pnand %p1013_p7, %p1009_p11 }
  0x3c   : > { %v819_v44 = vld [vmem:[#allocation5 + $0xc0] sm:$0xff] }
  0x3d   : > { %289 = vmatpush.bf16.msra.mxu0 %v799_v6  ;;  %533 = vmatpush.bf16.msra.mxu3 %v825_v32  ;;  %v899_v51 = vld [vmem:[#allocation7 + $0x3] ss:$0 sm:$0xff] }
  0x3e   : > { %371 = vmatpush.bf16.msra.mxu1 %v807_v7 }
  0x3f   : > { %452 = vmatpush.bf16.msra.mxu2 %v816_v19 }
  0x41   : > { %290 = vmatpush.bf16.msra.mxu0 %v798_v8  ;;  %534 = vmatpush.bf16.msra.mxu3 %v824_v33 }
  0x42   : > { %372 = vmatpush.bf16.msra.mxu1 %v806_v9 }
  0x43   : > { %453 = vmatpush.bf16.msra.mxu2 %v815_v20 }
  0x45   : > { %291 = vmatpush.bf16.msra.mxu0 %v797_v10  ;;  %535 = vmatpush.bf16.msra.mxu3 %v823_v34 }
  0x46   : > { %373 = vmatpush.bf16.msra.mxu1 %v805_v11 }
  0x47   : > { %454 = vmatpush.bf16.msra.mxu2 %v814_v21 }
  0x49   : > { %292 = vmatpush.bf16.msra.mxu0 %v796_v12  ;;  %536 = vmatpush.bf16.msra.mxu3 %v822_v35 }
  0x4a   : > { %374 = vmatpush.bf16.msra.mxu1 %v804_v15 }
  0x4b   : > { %455 = vmatpush.bf16.msra.mxu2 %v813_v22 }
  0x4d   : > { %293 = vmatpush.bf16.msra.mxu0 %v795_v13  ;;  %537 = vmatpush.bf16.msra.mxu3 %v821_v36 }
  0x4e   : > { %375 = vmatpush.bf16.msra.mxu1 %v803_v16 }
  0x4f   : > { %456 = vmatpush.bf16.msra.mxu2 %v812_v29 }
  0x50   : > { %294 = vmatmul.bf16.vlgmr.msra.gmra.mxu0 %v219_v14 }
  0x51   : > { %538 = vmatpush.bf16.msra.mxu3 %v820_v43 }
  0x53   : > { %457 = vmatpush.bf16.msra.mxu2 %v811_v30 }
  0x55   : > { %539 = vmatpush.bf16.msra.mxu3 %v819_v44 }
  0xcd   : > { %v295_v24 = vpop.f32.mrf.mxu0 }
  0xce   : > { %v296_v25 = vadd.f32 %v896_v23, %v295_v24 }
  0xd0   : > { %v299_v26 = vmax.f32 %v296_v25, 0.0 }
  0xd2   : > { %v300_v27 = vpack.c.bf16 %v299_v26, %v299_v26 }
  0xd4   : > { %376 = vmatmul.bf16.vlgmr.msra.gmra.mxu1 %v300_v27 }
  0xd5   : > { %v297_v28 = vpop.f32.mrf.mxu0 }
 0x151   : > { %v377_v38 = vpop.f32.mrf.mxu1 }
 0x152   : > { %v378_v39 = vadd.f32 %v897_v37, %v377_v38 }
 0x154   : > { %v381_v40 = vmax.f32 %v378_v39, 0.0 }
 0x156   : > { %v382_v41 = vpack.c.bf16 %v381_v40, %v381_v40 }
 0x158   : > { %458 = vmatmul.bf16.vlgmr.msra.gmra.mxu2 %v382_v41 }
 0x159   : > { %v379_v42 = vpop.f32.mrf.mxu1 }
 0x1db   : > { %v459_v46 = vpop.f32.mrf.mxu2 }
 0x1dc   : > { %v460_v47 = vadd.f32 %v898_v45, %v459_v46 }
 0x1de   : > { %v463_v48 = vmax.f32 %v460_v47, 0.0 }
 0x1e0   : > { %v464_v49 = vpack.c.bf16 %v463_v48, %v463_v48 }
 0x1e2   : > { %540 = vmatmul.bf16.vlgmr.msra.gmra.mxu3 %v464_v49 }
 0x1e3   : > { %v461_v50 = vpop.f32.mrf.mxu2 }
 0x265   : > { %v541_v52 = vpop.f32.mrf.mxu3 }
 0x266   : > { %v542_v53 = vadd.f32 %v899_v51, %v541_v52 }
 0x268   : > { %545 = vst [vmem:[%s218_s27] sm:$0xff] %v542_v53 }
 0x269   : > { %1017 = shalt.err (!%p1014_p8)
}
 0x26a   : > { %837 = dma.vmem_to_hbm [thread:$0]  (%p1154_p2), %s560_s28, 128, %s562_s29, %s547_s30  }
 0x26d   : > { %v543_v54 = vpop.f32.mrf.mxu3 }
 0x26e PF: > { %p859_p9 = scmp.ge.s32.totalorder %s1060_s15, 2  ;;  %s573_s10 = sand.u32 1, %s1048_s12  }
 0x26f   : > { %s574_s22 = scalar_lea.sflag [#allocation4], %s573_s10 }
 0x270   : > { %p851_p10 = pnand %p859_p9, %p1158_p4 }
 0x272   : > { %p852_p12 = pneg %p851_p10 }
 0x274   : > { %1043 = dma.done.wait (%p852_p12), %s574_s22, 128  }
 0x275   : > { %1045 = vsyncadd (%p852_p12), %s574_s22, 4294967168  ;;  %p17_p13 = scmp.ge.s32.totalorder %s1128_s4, 6   ;;  %s1243_s12 = smov %s1052_s13 }
 0x276   : > { %s1244_s13 = smov %s1056_s14  ;;  %s1245_s14 = smov %s1139_s7 }
 0x277   : > { %s1246_s15 = smov %s1128_s4  ;;  %19 = sbr.rel (!%p17_p13) target bundleno = 6 (0x6), region = 88 }
 0x27c   :  { %580 = vsyncpa [#allocation3], 1 }
 0x27d   :  { %582 = vsyncpa [#allocation3 + $0x1], 1 }
 0x27e   :  { %583 = vsyncpa [#allocation6], 1 }
 0x27f   :  { %584 = vsyncpa [#allocation4], 1 }
 0x280   :  { %586 = vsyncpa [#allocation4 + $0x1], 1 }

</bundles_post_ra>
